<compile_context>
chip_gen: v7x
topology: tpu7x:2x2x1
jax: 0.10.0
libtpu: 0.0.40
codegen_flags: <defaults>
</compile_context>

<pallas_src>
import functools

import jax
import jax.numpy as jnp
from jax import lax
from jax.experimental import pallas as pl
from jax.experimental.pallas import tpu as pltpu

LEAKY_SLOPE = 0.01   # F.leaky_relu default
IN_EPS = 1e-5        # nn.InstanceNorm2d default (affine=False, no running stats)


# ---------------------------------------------------------------------------
# helpers
# ---------------------------------------------------------------------------
@functools.lru_cache(maxsize=None)
def _vmem_limit_bytes():
    """Scoped VMEM limit with headroom, portable across v5e/v6e/v7x."""
    try:
        cap = int(pltpu.get_tpu_info().vmem_capacity_bytes)
    except Exception:
        cap = 64 * 1024 * 1024
    return min(100 * 1024 * 1024, (cap // 4) * 3)


def _fused_fits(c_pad, cout, E, has_residual):
    """Can a whole batch (all E edges) be processed by one kernel invocation?"""
    per_edge = 2 * 5 * c_pad          # gathered block (double-buffered)
    per_edge += 2 * cout              # output block (double-buffered)
    if has_residual:
        per_edge += 2 * cout          # residual block (double-buffered)
    per_edge += 7 * c_pad + 4 * cout  # in-kernel temporaries (feats slab, y, diffs)
    need = 4 * (per_edge * E + 2 * 7 * c_pad * cout + 2 * cout)
    return need <= int(0.6 * _vmem_limit_bytes())


def _pick_tile_e(E, c_pad, cout):
    """Largest E tile (multiple of 128, divides E) whose per-step working set
       stays under a fraction of scoped VMEM (keeps double-buffering on v7x)."""
    if E % 128 != 0:
        return E
    budget = max(2 * 1024 * 1024, _vmem_limit_bytes() // 6)
    best = 128
    for cand in (128, 256, 512, 1024, 2048, 4096):
        if E % cand == 0 and 4 * cand * (17 * c_pad + 4 * cout) <= budget:
            best = cand
    return best


def fuse_conv_weight(w_conv):
    """PyTorch Conv2d weight (Cout, Cin, 1, 7) -> fused (Cout, 7*Cin_pad),
       Cin zero-padded to a multiple of 8 so the kernel's feature slab is
       sublane-tile aligned.  Fused row index = j*Cin_pad + ci."""
    cout, cin, _, k = w_conv.shape
    cin_pad = -(-cin // 8) * 8
    w = jnp.transpose(w_conv[:, :, 0, :], (0, 2, 1))        # (Cout, 7, Cin)
    w = jnp.pad(w, ((0, 0), (0, 0), (0, cin_pad - cin)))    # zero padded channels
    return w.reshape(cout, k * cin_pad)


# ---------------------------------------------------------------------------
# Pallas kernels
# ---------------------------------------------------------------------------
def _conv_body(gath_ref, w_ref, b_ref):
    """Symmetric 1-ring functions + fused (1,7) conv.

    gath_ref: (5, Cpad, TE)  w_ref: (Cout, 7*Cpad)  b_ref: (Cout, 1)
    returns y: (Cout, TE) float32
    """
    f0 = gath_ref[0]
    f1 = gath_ref[1]
    f2 = gath_ref[2]
    f3 = gath_ref[3]
    f4 = gath_ref[4]

    x1 = f1 + f3
    x2 = f2 + f4
    x3 = jnp.abs(f1 - f3)
    x4 = jnp.abs(f2 - f4)
    x5 = x1 + x2
    avg = x5 * 0.25
    d1 = f1 - avg
    d2 = f2 - avg
    d3 = f3 - avg
    d4 = f4 - avg
    x6 = d1 * d1 + d2 * d2 + d3 * d3 + d4 * d4

    # One fused MXU contraction over K = 7*Cpad (instead of 7 small matmuls).
    feats = jnp.concatenate([f0, x1, x2, x3, x4, x5, x6], axis=0)  # (7*Cpad, TE)
    y = jnp.dot(w_ref[...], feats, preferred_element_type=jnp.float32)
    return y + b_ref[...]                    # (Cout, 1) broadcasts over lanes


def _leaky(y):
    return jnp.where(y > 0, y, LEAKY_SLOPE * y)


# ---- single-pass (whole batch in VMEM) kernels ------------------------------
def _conv_norm_act_kernel(gath_ref, w_ref, b_ref, o_ref):
    """conv + InstanceNorm + leaky_relu for one full batch."""
    y = _conv_body(gath_ref, w_ref, b_ref)                         # (Cout, E)
    mean = jnp.mean(y, axis=1, keepdims=True)
    d = y - mean
    var = jnp.mean(d * d, axis=1, keepdims=True)
    y = d * lax.rsqrt(var + IN_EPS)
    o_ref[...] = _leaky(y)


def _conv_norm_act_res_kernel(gath_ref, w_ref, b_ref, res_ref, o_ref):
    """conv + InstanceNorm + residual add + leaky_relu for one full batch."""
    y = _conv_body(gath_ref, w_ref, b_ref)
    mean = jnp.mean(y, axis=1, keepdims=True)
    d = y - mean
    var = jnp.mean(d * d, axis=1, keepdims=True)
    y = d * lax.rsqrt(var + IN_EPS) + res_ref[...]
    o_ref[...] = _leaky(y)


# ---- tiled two-pass kernels --------------------------------------------------
def _conv_stats_kernel(gath_ref, w_ref, b_ref, y_ref, st_ref):
    """Pass 1: conv + per-tile sum/sumsq partials for the two-pass InstanceNorm.

    y_ref: (Cout, TE)   st_ref: (Cout, 2)  [sum, sumsq over this tile]
    """
    y = _conv_body(gath_ref, w_ref, b_ref)
    y_ref[...] = y
    st_ref[...] = jnp.concatenate(
        [jnp.sum(y, axis=1, keepdims=True),
         jnp.sum(y * y, axis=1, keepdims=True)], axis=1)           # (Cout, 2)


def _norm_act_kernel(y_ref, p_ref, o_ref):
    """Pass 2: InstanceNorm (precomputed mean / inv_std) + leaky_relu."""
    mean = p_ref[:, 0:1]
    inv_std = p_ref[:, 1:2]
    o_ref[...] = _leaky((y_ref[...] - mean) * inv_std)


def _norm_act_res_kernel(y_ref, p_ref, res_ref, o_ref):
    """Pass 2: InstanceNorm + residual add (before activation) + leaky_relu."""
    mean = p_ref[:, 0:1]
    inv_std = p_ref[:, 1:2]
    o_ref[...] = _leaky((y_ref[...] - mean) * inv_std + res_ref[...])


# ---------------------------------------------------------------------------
# One MeshConv2 + InstanceNorm (+ residual) + leaky_relu layer
# ---------------------------------------------------------------------------
def mesh_conv_layer(gath, w_fused, bias, residual=None, tile_e=None):
    """gath: (B, 5, Cpad, E) float32, w_fused: (Cout, 7*Cpad), bias: (Cout, 1),
       residual: optional (B, Cout, E).  Returns (B, Cout, E) float32."""
    B, _, c_pad, E = gath.shape
    Cout, K = w_fused.shape
    assert K == 7 * c_pad
    out_shape = jax.ShapeDtypeStruct((B, Cout, E), jnp.float32)

    # ---- fast path: whole batch fits -> single fused kernel per layer ------
    use_fused = ((tile_e is None or tile_e == E)
                 and _fused_fits(c_pad, Cout, E, residual is not None))
    if use_fused:
        cparams = pltpu.CompilerParams(
            dimension_semantics=("parallel",),
            vmem_limit_bytes=_vmem_limit_bytes())
        gath_spec = pl.BlockSpec((None, 5, c_pad, E), lambda b: (b, 0, 0, 0))
        w_spec = pl.BlockSpec((Cout, K), lambda b: (0, 0))
        b_spec = pl.BlockSpec((Cout, 1), lambda b: (0, 0))
        y_spec = pl.BlockSpec((None, Cout, E), lambda b: (b, 0, 0))
        if residual is None:
            return pl.pallas_call(
                _conv_norm_act_kernel,
                out_shape=out_shape,
                grid=(B,),
                in_specs=[gath_spec, w_spec, b_spec],
                out_specs=y_spec,
                compiler_params=cparams,
            )(gath, w_fused, bias)
        return pl.pallas_call(
            _conv_norm_act_res_kernel,
            out_shape=out_shape,
            grid=(B,),
            in_specs=[gath_spec, w_spec, b_spec, y_spec],
            out_specs=y_spec,
            compiler_params=cparams,
        )(gath, w_fused, bias, residual)

    # ---- tiled two-pass path -----------------------------------------------
    if tile_e is None:
        tile_e = _pick_tile_e(E, c_pad, Cout)
    assert tile_e == E or (tile_e % 128 == 0 and E % tile_e == 0)
    n_e = E // tile_e

    cparams = pltpu.CompilerParams(
        dimension_semantics=("parallel", "parallel"),
        vmem_limit_bytes=_vmem_limit_bytes())

    # pass 1: conv + per-tile statistics
    y, part = pl.pallas_call(
        _conv_stats_kernel,
        out_shape=(jax.ShapeDtypeStruct((B, Cout, E), jnp.float32),
                   jax.ShapeDtypeStruct((B, n_e, Cout, 2), jnp.float32)),
        grid=(B, n_e),
        in_specs=[
            pl.BlockSpec((None, 5, c_pad, tile_e), lambda b, e: (b, 0, 0, e)),
            pl.BlockSpec((Cout, K), lambda b, e: (0, 0)),
            pl.BlockSpec((Cout, 1), lambda b, e: (0, 0)),
        ],
        out_specs=(
            pl.BlockSpec((None, Cout, tile_e), lambda b, e: (b, 0, e)),
            pl.BlockSpec((None, None, Cout, 2), lambda b, e: (b, e, 0, 0)),
        ),
        compiler_params=cparams,
    )(gath, w_fused, bias)

    # tiny JAX reduction: per-(batch, channel) mean / inv_std over all edges
    stats = jnp.sum(part, axis=1)                       # (B, Cout, 2)
    inv_n = 1.0 / E
    mean = stats[..., 0] * inv_n
    var = stats[..., 1] * inv_n - mean * mean
    inv_std = lax.rsqrt(jnp.maximum(var, 0.0) + IN_EPS)
    norm_p = jnp.stack([mean, inv_std], axis=-1)        # (B, Cout, 2)

    # pass 2: normalize (+ residual) + leaky_relu
    y_spec = pl.BlockSpec((None, Cout, tile_e), lambda b, e: (b, 0, e))
    p_spec = pl.BlockSpec((None, Cout, 2), lambda b, e: (b, 0, 0))

    if residual is None:
        return pl.pallas_call(
            _norm_act_kernel,
            out_shape=out_shape,
            grid=(B, n_e),
            in_specs=[y_spec, p_spec],
            out_specs=y_spec,
            compiler_params=cparams,
        )(y, norm_p)

    return pl.pallas_call(
        _norm_act_res_kernel,
        out_shape=out_shape,
        grid=(B, n_e),
        in_specs=[y_spec, p_spec, y_spec],
        out_specs=y_spec,
        compiler_params=cparams,
    )(y, norm_p, residual)


# ---------------------------------------------------------------------------
# JAX glue: pad_gemm / create_GeMM gather (kernel layout, no extra transposes)
# ---------------------------------------------------------------------------
def build_gemm_indices(gemm_edges_list, xsz):
    """pad_gemm per mesh + the `Gi + 1` shift from create_GeMM.
       Returns int32 (B, 5, E) indices into the zero-padded edge axis."""
    rows = []
    for ge in gemm_edges_list:
        ec = ge.shape[0]
        own = jnp.arange(ec, dtype=jnp.int32)[None, :]              # (1, ec)
        g = jnp.concatenate([own, ge.astype(jnp.int32).T], axis=0)  # (5, ec)
        g = jnp.pad(g, ((0, 0), (0, xsz - ec)))                     # pad rows -> 0
        rows.append(g)
    return jnp.stack(rows, axis=0) + 1                              # index 0 -> zero pad


def gather_neighbors(x, Gi_t):
    """x: (B, C, E) edge features; Gi_t: (B, 5, E) shifted indices.
       Returns (B, 5, Cpad, E) gathered features, channels padded to mult of 8."""
    B, C, E = x.shape
    c_pad = -(-C // 8) * 8
    x_pad = jnp.concatenate([jnp.zeros((B, C, 1), x.dtype), x], axis=2)  # (B,C,E+1)
    if c_pad != C:
        x_pad = jnp.pad(x_pad, ((0, 0), (0, c_pad - C), (0, 0)))
    b_idx = jnp.arange(B)[:, None, None, None]
    c_idx = jnp.arange(c_pad)[None, None, :, None]
    e_idx = Gi_t[:, :, None, :]                                     # (B,5,1,E)
    return x_pad[b_idx, c_idx, e_idx]                               # (B,5,Cpad,E)


# ---------------------------------------------------------------------------
# DownConv forward (blocks residual chain, pool=0)
# ---------------------------------------------------------------------------
def down_conv_forward(fe, gemm_edges_list, weights, biases, tile_e=None):
    """fe: (B, Cin, E, 1) like PyTorch.  weights[i]: fused (Cout, 7*Cpad_i),
       biases[i]: (Cout, 1).  Returns ((B, Cout, E), None)."""
    x = fe[..., 0]                                      # squeeze(-1): (B, Cin, E)
    E = x.shape[2]
    Gi_t = build_gemm_indices(gemm_edges_list, E)       # (B, 5, E)

    gath = gather_neighbors(x, Gi_t)
    x1 = mesh_conv_layer(gath, weights[0], biases[0], tile_e=tile_e)  # (B,Cout,E)
    x2 = x1
    for idx in range(1, len(weights)):
        gath_i = gather_neighbors(x1, Gi_t)
        x2 = mesh_conv_layer(gath_i, weights[idx], biases[idx],
                             residual=x1, tile_e=tile_e)
        x1 = x2

    # TODO(synk): MeshPool2 (heap-driven mesh edge collapse) has no clean Pallas
    # equivalent; this mirrors the pool=0 path, so before_pool is None.
    return x2, None


# ---------------------------------------------------------------------------
# Pure-JAX reference (mirrors the PyTorch math) for validation
# ---------------------------------------------------------------------------
def _ref_mesh_conv(x, Gi_t, w_conv, b_conv):
    """x: (B, C, E); w_conv: (Cout, Cin, 1, 7); b_conv: (Cout,) -> (B, Cout, E)."""
    B, C, E = x.shape
    x_pad = jnp.concatenate([jnp.zeros((B, C, 1), x.dtype), x], axis=2)
    b_idx = jnp.arange(B)[:, None, None, None]
    c_idx = jnp.arange(C)[None, :, None, None]
    e_idx = jnp.transpose(Gi_t, (0, 2, 1))[:, None, :, :]   # (B,1,E,5)
    f = x_pad[b_idx, c_idx, e_idx]                           # (B,C,E,5)
    f1, f2, f3, f4 = f[..., 1], f[..., 2], f[..., 3], f[..., 4]
    x1 = f1 + f3; x2 = f2 + f4
    x3 = jnp.abs(f1 - f3); x4 = jnp.abs(f2 - f4)
    x5 = f1 + f2 + f3 + f4; avg = x5 / 4
    x6 = (f1 - avg) ** 2 + (f2 - avg) ** 2 + (f3 - avg) ** 2 + (f4 - avg) ** 2
    G = jnp.stack([f[..., 0], x1, x2, x3, x4, x5, x6], axis=3)   # (B,C,E,7)
    out = jnp.einsum('bcej,ocj->boe', G, w_conv[:, :, 0, :],
                     precision=lax.Precision.HIGHEST)
    return out + b_conv[None, :, None]


def _ref_in_norm(y):
    mean = jnp.mean(y, axis=2, keepdims=True)
    var = jnp.mean((y - mean) ** 2, axis=2, keepdims=True)
    return (y - mean) / jnp.sqrt(var + IN_EPS)


def _ref_leaky(y):
    return jnp.where(y > 0, y, LEAKY_SLOPE * y)


def down_conv_reference(fe, gemm_edges_list, raw_weights, raw_biases):
    x = fe[..., 0]
    E = x.shape[2]
    Gi_t = build_gemm_indices(gemm_edges_list, E)
    x1 = _ref_leaky(_ref_in_norm(_ref_mesh_conv(x, Gi_t, raw_weights[0], raw_biases[0])))
    x2 = x1
    for idx in range(1, len(raw_weights)):
        y = _ref_in_norm(_ref_mesh_conv(x1, Gi_t, raw_weights[idx], raw_biases[idx]))
        x2 = _ref_leaky(y + x1)
        x1 = x2
    return x2


# ---------------------------------------------------------------------------
if __name__ == "__main__":
    B, C_IN, C_OUT, E, BLOCKS = 2, 4, 8, 256, 1

    key = jax.random.PRNGKey(0)
    k_fe, k_ge, k_w = jax.random.split(key, 3)

    # edge features (B, C_in, E, 1) and synthetic per-mesh 1-ring tables (E, 4)
    fe = jax.random.normal(k_fe, (B, C_IN, E, 1), dtype=jnp.float32)
    ge_keys = jax.random.split(k_ge, B)
    gemm_edges_list = [
        jax.random.randint(ge_keys[i], (E, 4), 0, E).astype(jnp.int32)
        for i in range(B)
    ]

    # Conv2d params: layer 0 is (C_in -> C_out), rest (C_out -> C_out)
    raw_weights, raw_biases = [], []
    fused_weights, kernel_biases = [], []
    wkeys = jax.random.split(k_w, 2 * (BLOCKS + 1))
    for layer in range(BLOCKS + 1):
        cin = C_IN if layer == 0 else C_OUT
        w_conv = 0.1 * jax.random.normal(wkeys[2 * layer], (C_OUT, cin, 1, 7),
                                         dtype=jnp.float32)
        b_conv = 0.1 * jax.random.normal(wkeys[2 * layer + 1], (C_OUT,),
                                         dtype=jnp.float32)
        raw_weights.append(w_conv)
        raw_biases.append(b_conv)
        fused_weights.append(fuse_conv_weight(w_conv))
        kernel_biases.append(b_conv.reshape(C_OUT, 1))

    ref = down_conv_reference(fe, gemm_edges_list, raw_weights, raw_biases)

    # 1) fully-fused single-pass path (whole batch per kernel invocation)
    fwd_fused = jax.jit(down_conv_forward)
    out_fused, before_pool = fwd_fused(fe, gemm_edges_list, fused_weights,
                                       kernel_biases)
    out_fused = jax.block_until_ready(out_fused)
    assert out_fused.shape == (B, C_OUT, E)
    assert before_pool is None
    err_fused = float(jnp.max(jnp.abs(out_fused - ref)))
    assert jnp.allclose(out_fused, ref, rtol=2e-3, atol=2e-3), err_fused

    # 2) tiled two-pass path (exercises the large-E code path: E/tile_e = 2)
    fwd_tiled = jax.jit(functools.partial(down_conv_forward, tile_e=128))
    out_tiled, _ = fwd_tiled(fe, gemm_edges_list, fused_weights, kernel_biases)
    out_tiled = jax.block_until_ready(out_tiled)
    err_tiled = float(jnp.max(jnp.abs(out_tiled - ref)))
    assert jnp.allclose(out_tiled, ref, rtol=2e-3, atol=2e-3), err_tiled

    print("KERNEL_OK")
</pallas_src>

<mosaic_0001>
module attributes {stable_mosaic.version = 11 : i64} {
  func.func @_conv_norm_act_kernel(%arg0: i32, %arg1: memref<1x5x8x256xf32, #tpu.memory_space<vmem>>, %arg2: memref<8x56xf32, #tpu.memory_space<vmem>>, %arg3: memref<8x1xf32, #tpu.memory_space<vmem>>, %arg4: memref<1x8x256xf32, #tpu.memory_space<vmem>>) attributes {dimension_semantics = [#tpu.dimension_semantics<parallel>], iteration_bounds = array<i64: 2>, scalar_prefetch = 0 : i64, scratch_operands = 0 : i64, tpu.core_type = #tpu.core_type<tc>, window_params = [{transform_indices = @transform_0, window_bounds = array<i64: 1, 5, 8, 256>}, {pipeline_mode = #tpu.pipeline_mode<synchronous>, transform_indices = @transform_1, window_bounds = array<i64: 8, 56>}, {pipeline_mode = #tpu.pipeline_mode<synchronous>, transform_indices = @transform_2, window_bounds = array<i64: 8, 1>}, {transform_indices = @transform_3, window_bounds = array<i64: 1, 8, 256>}]} {
    %c0 = arith.constant 0 : index
    %c0_0 = arith.constant 0 : index
    %c0_1 = arith.constant 0 : index
    %c0_2 = arith.constant 0 : index
    %0 = vector.load %arg1[%c0, %c0_0, %c0_1, %c0_2] : memref<1x5x8x256xf32, #tpu.memory_space<vmem>>, vector<1x1x8x256xf32>
    %1 = vector.shape_cast %0 : vector<1x1x8x256xf32> to vector<8x256xf32>
    %c0_3 = arith.constant 0 : index
    %c1 = arith.constant 1 : index
    %c0_4 = arith.constant 0 : index
    %c0_5 = arith.constant 0 : index
    %2 = vector.load %arg1[%c0_3, %c1, %c0_4, %c0_5] : memref<1x5x8x256xf32, #tpu.memory_space<vmem>>, vector<1x1x8x256xf32>
    %3 = vector.shape_cast %2 : vector<1x1x8x256xf32> to vector<8x256xf32>
    %c0_6 = arith.constant 0 : index
    %c2 = arith.constant 2 : index
    %c0_7 = arith.constant 0 : index
    %c0_8 = arith.constant 0 : index
    %4 = vector.load %arg1[%c0_6, %c2, %c0_7, %c0_8] : memref<1x5x8x256xf32, #tpu.memory_space<vmem>>, vector<1x1x8x256xf32>
    %5 = vector.shape_cast %4 : vector<1x1x8x256xf32> to vector<8x256xf32>
    %c0_9 = arith.constant 0 : index
    %c3 = arith.constant 3 : index
    %c0_10 = arith.constant 0 : index
    %c0_11 = arith.constant 0 : index
    %6 = vector.load %arg1[%c0_9, %c3, %c0_10, %c0_11] : memref<1x5x8x256xf32, #tpu.memory_space<vmem>>, vector<1x1x8x256xf32>
    %7 = vector.shape_cast %6 : vector<1x1x8x256xf32> to vector<8x256xf32>
    %c0_12 = arith.constant 0 : index
    %c4 = arith.constant 4 : index
    %c0_13 = arith.constant 0 : index
    %c0_14 = arith.constant 0 : index
    %8 = vector.load %arg1[%c0_12, %c4, %c0_13, %c0_14] : memref<1x5x8x256xf32, #tpu.memory_space<vmem>>, vector<1x1x8x256xf32>
    %9 = vector.shape_cast %8 : vector<1x1x8x256xf32> to vector<8x256xf32>
    %10 = arith.addf %3, %7 : vector<8x256xf32>
    %11 = arith.addf %5, %9 : vector<8x256xf32>
    %12 = arith.subf %3, %7 : vector<8x256xf32>
    %13 = math.absf %12 : vector<8x256xf32>
    %14 = arith.subf %5, %9 : vector<8x256xf32>
    %15 = math.absf %14 : vector<8x256xf32>
    %16 = arith.addf %10, %11 : vector<8x256xf32>
    %cst = arith.constant 2.500000e-01 : f32
    %17 = vector.broadcast %cst : f32 to vector<8x256xf32>
    %18 = arith.mulf %16, %17 : vector<8x256xf32>
    %19 = arith.subf %3, %18 : vector<8x256xf32>
    %20 = arith.subf %5, %18 : vector<8x256xf32>
    %21 = arith.subf %7, %18 : vector<8x256xf32>
    %22 = arith.subf %9, %18 : vector<8x256xf32>
    %23 = arith.mulf %19, %19 : vector<8x256xf32>
    %24 = arith.mulf %20, %20 : vector<8x256xf32>
    %25 = arith.addf %23, %24 : vector<8x256xf32>
    %26 = arith.mulf %21, %21 : vector<8x256xf32>
    %27 = arith.addf %25, %26 : vector<8x256xf32>
    %28 = arith.mulf %22, %22 : vector<8x256xf32>
    %29 = arith.addf %27, %28 : vector<8x256xf32>
    %30 = tpu.concatenate %1, %10, %11, %13, %15, %16, %29 in 0 : vector<8x256xf32>, vector<8x256xf32>, vector<8x256xf32>, vector<8x256xf32>, vector<8x256xf32>, vector<8x256xf32>, vector<8x256xf32> -> vector<56x256xf32>
    %c0_15 = arith.constant 0 : index
    %c0_16 = arith.constant 0 : index
    %31 = vector.load %arg2[%c0_15, %c0_16] : memref<8x56xf32, #tpu.memory_space<vmem>>, vector<8x56xf32>
    %cst_17 = arith.constant dense<0.000000e+00> : vector<8x256xf32>
    %32 = tpu.matmul %31, %30, %cst_17 {dimension_numbers = #tpu.dot_dimension_numbers<[1], [0], [0], [1], [0, 0, 1, 1], [], []>} : vector<8x56xf32>, vector<56x256xf32>, vector<8x256xf32> -> vector<8x256xf32>
    %c0_18 = arith.constant 0 : index
    %c0_19 = arith.constant 0 : index
    %33 = vector.load %arg3[%c0_18, %c0_19] : memref<8x1xf32, #tpu.memory_space<vmem>>, vector<8x1xf32>
    %34 = vector.broadcast %33 : vector<8x1xf32> to vector<8x256xf32>
    %35 = arith.addf %32, %34 : vector<8x256xf32>
    %cst_20 = arith.constant dense<0.000000e+00> : vector<8xf32>
    %36 = vector.multi_reduction <add>, %35, %cst_20 [1] : vector<8x256xf32> to vector<8xf32>
    %37 = vector.shape_cast %36 : vector<8xf32> to vector<8x1xf32>
    %cst_21 = arith.constant 2.560000e+02 : f32
    %38 = vector.broadcast %cst_21 : f32 to vector<8x1xf32>
    %39 = arith.divf %37, %38 : vector<8x1xf32>
    %40 = vector.broadcast %39 : vector<8x1xf32> to vector<8x256xf32>
    %41 = arith.subf %35, %40 : vector<8x256xf32>
    %42 = arith.mulf %41, %41 : vector<8x256xf32>
    %cst_22 = arith.constant dense<0.000000e+00> : vector<8xf32>
    %43 = vector.multi_reduction <add>, %42, %cst_22 [1] : vector<8x256xf32> to vector<8xf32>
    %44 = vector.shape_cast %43 : vector<8xf32> to vector<8x1xf32>
    %cst_23 = arith.constant 2.560000e+02 : f32
    %45 = vector.broadcast %cst_23 : f32 to vector<8x1xf32>
    %46 = arith.divf %44, %45 : vector<8x1xf32>
    %cst_24 = arith.constant 9.99999974E-6 : f32
    %47 = vector.broadcast %cst_24 : f32 to vector<8x1xf32>
    %48 = arith.addf %46, %47 : vector<8x1xf32>
    %49 = math.rsqrt %48 : vector<8x1xf32>
    %50 = vector.broadcast %49 : vector<8x1xf32> to vector<8x256xf32>
    %51 = arith.mulf %41, %50 : vector<8x256xf32>
    %cst_25 = arith.constant 0.000000e+00 : f32
    %52 = vector.broadcast %cst_25 : f32 to vector<8x256xf32>
    %53 = arith.cmpf ogt, %51, %52 : vector<8x256xf32>
    %cst_26 = arith.constant 0.00999999977 : f32
    %54 = vector.broadcast %cst_26 : f32 to vector<8x256xf32>
    %55 = arith.mulf %54, %51 : vector<8x256xf32>
    %56 = arith.select %53, %51, %55 : vector<8x256xi1>, vector<8x256xf32>
    %c0_27 = arith.constant 0 : index
    %c0_28 = arith.constant 0 : index
    %c0_29 = arith.constant 0 : index
    %57 = vector.load %arg4[%c0_27, %c0_28, %c0_29] : memref<1x8x256xf32, #tpu.memory_space<vmem>>, vector<1x8x256xf32>
    %58 = vector.shape_cast %57 : vector<1x8x256xf32> to vector<8x256xf32>
    %59 = vector.shape_cast %56 : vector<8x256xf32> to vector<1x8x256xf32>
    tpu.vector_store %arg4[%c0_27, %c0_28, %c0_29], %59 {strides = array<i32>} : memref<1x8x256xf32, #tpu.memory_space<vmem>>, vector<1x8x256xf32>,
    return
  }
  func.func @transform_0(%arg0: i32) -> (i32, i32, i32, i32) {
    %c0_i32 = arith.constant 0 : i32
    %c0_i32_0 = arith.constant 0 : i32
    %c0_i32_1 = arith.constant 0 : i32
    %c0_i32_2 = arith.constant 0 : i32
    return %arg0, %c0_i32, %c0_i32_0, %c0_i32_1 : i32, i32, i32, i32
  }
  func.func @transform_1(%arg0: i32) -> (i32, i32) {
    %c0_i32 = arith.constant 0 : i32
    %c0_i32_0 = arith.constant 0 : i32
    %c0_i32_1 = arith.constant 0 : i32
    return %c0_i32, %c0_i32_0 : i32, i32
  }
  func.func @transform_2(%arg0: i32) -> (i32, i32) {
    %c0_i32 = arith.constant 0 : i32
    %c0_i32_0 = arith.constant 0 : i32
    %c0_i32_1 = arith.constant 0 : i32
    return %c0_i32, %c0_i32_0 : i32, i32
  }
  func.func @transform_3(%arg0: i32) -> (i32, i32, i32) {
    %c0_i32 = arith.constant 0 : i32
    %c0_i32_0 = arith.constant 0 : i32
    %c0_i32_1 = arith.constant 0 : i32
    return %arg0, %c0_i32, %c0_i32_0 : i32, i32, i32
  }
}

module attributes {stable_mosaic.version = 11 : i64} {
  func.func @_conv_norm_act_res_kernel(%arg0: i32, %arg1: memref<1x5x8x256xf32, #tpu.memory_space<vmem>>, %arg2: memref<8x56xf32, #tpu.memory_space<vmem>>, %arg3: memref<8x1xf32, #tpu.memory_space<vmem>>, %arg4: memref<1x8x256xf32, #tpu.memory_space<vmem>>, %arg5: memref<1x8x256xf32, #tpu.memory_space<vmem>>) attributes {dimension_semantics = [#tpu.dimension_semantics<parallel>], iteration_bounds = array<i64: 2>, scalar_prefetch = 0 : i64, scratch_operands = 0 : i64, tpu.core_type = #tpu.core_type<tc>, window_params = [{transform_indices = @transform_0, window_bounds = array<i64: 1, 5, 8, 256>}, {pipeline_mode = #tpu.pipeline_mode<synchronous>, transform_indices = @transform_1, window_bounds = array<i64: 8, 56>}, {pipeline_mode = #tpu.pipeline_mode<synchronous>, transform_indices = @transform_2, window_bounds = array<i64: 8, 1>}, {transform_indices = @transform_3, window_bounds = array<i64: 1, 8, 256>}, {transform_indices = @transform_4, window_bounds = array<i64: 1, 8, 256>}]} {
    %c0 = arith.constant 0 : index
    %c0_0 = arith.constant 0 : index
    %c0_1 = arith.constant 0 : index
    %c0_2 = arith.constant 0 : index
    %0 = vector.load %arg1[%c0, %c0_0, %c0_1, %c0_2] : memref<1x5x8x256xf32, #tpu.memory_space<vmem>>, vector<1x1x8x256xf32>
    %1 = vector.shape_cast %0 : vector<1x1x8x256xf32> to vector<8x256xf32>
    %c0_3 = arith.constant 0 : index
    %c1 = arith.constant 1 : index
    %c0_4 = arith.constant 0 : index
    %c0_5 = arith.constant 0 : index
    %2 = vector.load %arg1[%c0_3, %c1, %c0_4, %c0_5] : memref<1x5x8x256xf32, #tpu.memory_space<vmem>>, vector<1x1x8x256xf32>
    %3 = vector.shape_cast %2 : vector<1x1x8x256xf32> to vector<8x256xf32>
    %c0_6 = arith.constant 0 : index
    %c2 = arith.constant 2 : index
    %c0_7 = arith.constant 0 : index
    %c0_8 = arith.constant 0 : index
    %4 = vector.load %arg1[%c0_6, %c2, %c0_7, %c0_8] : memref<1x5x8x256xf32, #tpu.memory_space<vmem>>, vector<1x1x8x256xf32>
    %5 = vector.shape_cast %4 : vector<1x1x8x256xf32> to vector<8x256xf32>
    %c0_9 = arith.constant 0 : index
    %c3 = arith.constant 3 : index
    %c0_10 = arith.constant 0 : index
    %c0_11 = arith.constant 0 : index
    %6 = vector.load %arg1[%c0_9, %c3, %c0_10, %c0_11] : memref<1x5x8x256xf32, #tpu.memory_space<vmem>>, vector<1x1x8x256xf32>
    %7 = vector.shape_cast %6 : vector<1x1x8x256xf32> to vector<8x256xf32>
    %c0_12 = arith.constant 0 : index
    %c4 = arith.constant 4 : index
    %c0_13 = arith.constant 0 : index
    %c0_14 = arith.constant 0 : index
    %8 = vector.load %arg1[%c0_12, %c4, %c0_13, %c0_14] : memref<1x5x8x256xf32, #tpu.memory_space<vmem>>, vector<1x1x8x256xf32>
    %9 = vector.shape_cast %8 : vector<1x1x8x256xf32> to vector<8x256xf32>
    %10 = arith.addf %3, %7 : vector<8x256xf32>
    %11 = arith.addf %5, %9 : vector<8x256xf32>
    %12 = arith.subf %3, %7 : vector<8x256xf32>
    %13 = math.absf %12 : vector<8x256xf32>
    %14 = arith.subf %5, %9 : vector<8x256xf32>
    %15 = math.absf %14 : vector<8x256xf32>
    %16 = arith.addf %10, %11 : vector<8x256xf32>
    %cst = arith.constant 2.500000e-01 : f32
    %17 = vector.broadcast %cst : f32 to vector<8x256xf32>
    %18 = arith.mulf %16, %17 : vector<8x256xf32>
    %19 = arith.subf %3, %18 : vector<8x256xf32>
    %20 = arith.subf %5, %18 : vector<8x256xf32>
    %21 = arith.subf %7, %18 : vector<8x256xf32>
    %22 = arith.subf %9, %18 : vector<8x256xf32>
    %23 = arith.mulf %19, %19 : vector<8x256xf32>
    %24 = arith.mulf %20, %20 : vector<8x256xf32>
    %25 = arith.addf %23, %24 : vector<8x256xf32>
    %26 = arith.mulf %21, %21 : vector<8x256xf32>
    %27 = arith.addf %25, %26 : vector<8x256xf32>
    %28 = arith.mulf %22, %22 : vector<8x256xf32>
    %29 = arith.addf %27, %28 : vector<8x256xf32>
    %30 = tpu.concatenate %1, %10, %11, %13, %15, %16, %29 in 0 : vector<8x256xf32>, vector<8x256xf32>, vector<8x256xf32>, vector<8x256xf32>, vector<8x256xf32>, vector<8x256xf32>, vector<8x256xf32> -> vector<56x256xf32>
    %c0_15 = arith.constant 0 : index
    %c0_16 = arith.constant 0 : index
    %31 = vector.load %arg2[%c0_15, %c0_16] : memref<8x56xf32, #tpu.memory_space<vmem>>, vector<8x56xf32>
    %cst_17 = arith.constant dense<0.000000e+00> : vector<8x256xf32>
    %32 = tpu.matmul %31, %30, %cst_17 {dimension_numbers = #tpu.dot_dimension_numbers<[1], [0], [0], [1], [0, 0, 1, 1], [], []>} : vector<8x56xf32>, vector<56x256xf32>, vector<8x256xf32> -> vector<8x256xf32>
    %c0_18 = arith.constant 0 : index
    %c0_19 = arith.constant 0 : index
    %33 = vector.load %arg3[%c0_18, %c0_19] : memref<8x1xf32, #tpu.memory_space<vmem>>, vector<8x1xf32>
    %34 = vector.broadcast %33 : vector<8x1xf32> to vector<8x256xf32>
    %35 = arith.addf %32, %34 : vector<8x256xf32>
    %cst_20 = arith.constant dense<0.000000e+00> : vector<8xf32>
    %36 = vector.multi_reduction <add>, %35, %cst_20 [1] : vector<8x256xf32> to vector<8xf32>
    %37 = vector.shape_cast %36 : vector<8xf32> to vector<8x1xf32>
    %cst_21 = arith.constant 2.560000e+02 : f32
    %38 = vector.broadcast %cst_21 : f32 to vector<8x1xf32>
    %39 = arith.divf %37, %38 : vector<8x1xf32>
    %40 = vector.broadcast %39 : vector<8x1xf32> to vector<8x256xf32>
    %41 = arith.subf %35, %40 : vector<8x256xf32>
    %42 = arith.mulf %41, %41 : vector<8x256xf32>
    %cst_22 = arith.constant dense<0.000000e+00> : vector<8xf32>
    %43 = vector.multi_reduction <add>, %42, %cst_22 [1] : vector<8x256xf32> to vector<8xf32>
    %44 = vector.shape_cast %43 : vector<8xf32> to vector<8x1xf32>
    %cst_23 = arith.constant 2.560000e+02 : f32
    %45 = vector.broadcast %cst_23 : f32 to vector<8x1xf32>
    %46 = arith.divf %44, %45 : vector<8x1xf32>
    %cst_24 = arith.constant 9.99999974E-6 : f32
    %47 = vector.broadcast %cst_24 : f32 to vector<8x1xf32>
    %48 = arith.addf %46, %47 : vector<8x1xf32>
    %49 = math.rsqrt %48 : vector<8x1xf32>
    %50 = vector.broadcast %49 : vector<8x1xf32> to vector<8x256xf32>
    %51 = arith.mulf %41, %50 : vector<8x256xf32>
    %c0_25 = arith.constant 0 : index
    %c0_26 = arith.constant 0 : index
    %c0_27 = arith.constant 0 : index
    %52 = vector.load %arg4[%c0_25, %c0_26, %c0_27] : memref<1x8x256xf32, #tpu.memory_space<vmem>>, vector<1x8x256xf32>
    %53 = vector.shape_cast %52 : vector<1x8x256xf32> to vector<8x256xf32>
    %54 = arith.addf %51, %53 : vector<8x256xf32>
    %cst_28 = arith.constant 0.000000e+00 : f32
    %55 = vector.broadcast %cst_28 : f32 to vector<8x256xf32>
    %56 = arith.cmpf ogt, %54, %55 : vector<8x256xf32>
    %cst_29 = arith.constant 0.00999999977 : f32
    %57 = vector.broadcast %cst_29 : f32 to vector<8x256xf32>
    %58 = arith.mulf %57, %54 : vector<8x256xf32>
    %59 = arith.select %56, %54, %58 : vector<8x256xi1>, vector<8x256xf32>
    %c0_30 = arith.constant 0 : index
    %c0_31 = arith.constant 0 : index
    %c0_32 = arith.constant 0 : index
    %60 = vector.load %arg5[%c0_30, %c0_31, %c0_32] : memref<1x8x256xf32, #tpu.memory_space<vmem>>, vector<1x8x256xf32>
    %61 = vector.shape_cast %60 : vector<1x8x256xf32> to vector<8x256xf32>
    %62 = vector.shape_cast %59 : vector<8x256xf32> to vector<1x8x256xf32>
    tpu.vector_store %arg5[%c0_30, %c0_31, %c0_32], %62 {strides = array<i32>} : memref<1x8x256xf32, #tpu.memory_space<vmem>>, vector<1x8x256xf32>,
    return
  }
  func.func @transform_0(%arg0: i32) -> (i32, i32, i32, i32) {
    %c0_i32 = arith.constant 0 : i32
    %c0_i32_0 = arith.constant 0 : i32
    %c0_i32_1 = arith.constant 0 : i32
    %c0_i32_2 = arith.constant 0 : i32
    return %arg0, %c0_i32, %c0_i32_0, %c0_i32_1 : i32, i32, i32, i32
  }
  func.func @transform_1(%arg0: i32) -> (i32, i32) {
    %c0_i32 = arith.constant 0 : i32
    %c0_i32_0 = arith.constant 0 : i32
    %c0_i32_1 = arith.constant 0 : i32
    return %c0_i32, %c0_i32_0 : i32, i32
  }
  func.func @transform_2(%arg0: i32) -> (i32, i32) {
    %c0_i32 = arith.constant 0 : i32
    %c0_i32_0 = arith.constant 0 : i32
    %c0_i32_1 = arith.constant 0 : i32
    return %c0_i32, %c0_i32_0 : i32, i32
  }
  func.func @transform_3(%arg0: i32) -> (i32, i32, i32) {
    %c0_i32 = arith.constant 0 : i32
    %c0_i32_0 = arith.constant 0 : i32
    %c0_i32_1 = arith.constant 0 : i32
    return %arg0, %c0_i32, %c0_i32_0 : i32, i32, i32
  }
  func.func @transform_4(%arg0: i32) -> (i32, i32, i32) {
    %c0_i32 = arith.constant 0 : i32
    %c0_i32_0 = arith.constant 0 : i32
    %c0_i32_1 = arith.constant 0 : i32
    return %arg0, %c0_i32, %c0_i32_0 : i32, i32, i32
  }
}

</mosaic_0001>

<bundles_post_ra>
// kernel: down_conv_forward.3
= control target key start
LH: loop header
LB: loop body
LE: loop exit
PB: predicated region body
PF: predicated region fallthrough
CT: control target
= control target key end

     0   :  { %9 = vsyncpa [#allocation3], 0  ;;  %s751_s0 = inlined_call_operand.vmem [shape: f32[2,5,8,256], index: 0, kind: input, shape index: {}]   ;;  %s752_s1 = inlined_call_operand.vmem [shape: f32[8,56], index: 1, kind: input, shape index: {}]   ;;  %s753_s2 = inlined_call_operand.vmem [shape: f32[8,1], index: 2, kind: input, shape index: {}]   ;;  %s754_s3 = inlined_call_operand.vmem [shape: f32[2,8,256], index: 3, kind: input, shape index: {}]   ;;  %s755_s4 = inlined_call_operand.hbm [shape: f32[2,8,256], index: 4, kind: output, shape index: {}]  }
   0x1   :  { %11 = vsyncpa [#allocation3 + $0x1], 0  ;;  %s638_s15 = smov 0   ;;  %s640_s16 = smov 0  }
   0x2   :  { %s642_s17 = smov 0   ;;  %s644_s18 = smov 0  }
   0x3 LB: > { %s659_s19 = sadd.s32 4294967295, %s608_s18   ;;  %s465_s20 = sadd.s32 4294967294, %s608_s18   ;;  %s608_s18 = sphi %s644_s18, %s761_s18   ;;  %s604_s17 = sphi %s642_s17, %s760_s17   ;;  %s600_s16 = sphi %s640_s16, %s759_s16   ;;  %s596_s15 = sphi %s638_s15, %s758_s15  }
   0x4   : > { %s663_s21 = sadd.s32 1, %s608_s18   ;;  %s118_s22 = sadd.s32 1, %s604_s17 }
   0x5   : > { %s115_s23 = ssub.s32 %s608_s18, %s663_s21  ;;  %p128_p0 = scmp.ne.s32.totalorder %s604_s17, %s600_s16 }
   0x6   : > { %p116_p1 = scmp.eq.s32.totalorder %s115_s23, 0  ;;  %p129_p2 = scmp.eq.s32.totalorder %s659_s19, 1 }
   0x7   : > { %p134_p3 = scmp.ne.s32.totalorder %s600_s16, %s596_s15  ;;  %p135_p4 = scmp.eq.s32.totalorder %s465_s20, 1 }
   0x8   : > { %s674_s24 = scalar_select %p116_p1, %s604_s17, %s118_s22  }
   0x9   : > { %p676_p5 = por %p129_p2, %p128_p0  ;;  %p680_p6 = por %p135_p4, %p134_p3 }
   0xa   : > { %p468_p7 = scmp.ge.s32.totalorder %s608_s18, 1  ;;  %p175_p8 = scmp.lt.s32.totalorder %s608_s18, 3 }
   0xc   : > { %p176_p9 = pnand %p468_p7, %p175_p8 }
   0xd   : > { %p206_p10 = scmp.lt.s32.totalorder (!%p176_p9), %s659_s19, 1  ;;  %v269_v0 = vld [vmem:[%s753_s2] sm:$0xff] (!%p176_p9)  ;;  %v610_v1 = vmov (!%p176_p9), 0.0   ;;  %v611_v2 = vmov (!%p176_p9), 0   ;;  %vm275_vm0 = vcmask (!%p176_p9), 457728   ;;  %s203_s10 = sand.u32 (!%p176_p9), 1, %s600_s16  }
   0xe   : > { %179 = sbr.rel (%p176_p9) target bundleno = 592 (0x250), region = 36  ;;  %343 = vmatprep.mubr.f32.mxu0 (!%p176_p9), %v610_v1  ;;  %543 = vset.pattern.permute.xlu0 (!%p176_p9), %v611_v2  ;;  %v268_v57 = vld [vmem:[%s752_s1] sm:$0xff] (!%p176_p9)  ;;  %s469_s12 = sshll.u32 (!%p176_p9), %s203_s10, 4 }
   0xf   : > { %272 = vperm.xlu0 (!%p176_p9), %543, %v269_v0   ;;  %s488_s22 = sshll.u32 (!%p176_p9), %s659_s19, 8  ;;  %s205_s23 = scalar_lea.vmem (!%p176_p9), [#allocation2], %s469_s12 }
  0x10   : > { %s394_s27 = sshll.u32 (!%p176_p9), %s205_s23, 4  ;;  %s612_s6 = smov (!%p176_p9), [#allocation2]   ;;  %s711_s27 = int_to_ptr.vmem [resolvable:$true] %s394_s27 }
  0x11   : > { %s546_s5 = scalar_lea.vmem (!%p176_p9), %s711_s27, 256 }
  0x12   : > { %p547_p11 = scmp.ne.s32.totalorder (!%p176_p9), %s711_s27, %s546_s5 }
  0x14   : > { %p548_p12 = pnand (!%p176_p9), %p547_p11, %p676_p5 }
  0x15   : > { %s691_s29 = scalar_select %p206_p10, %s659_s19, 1 }
  0x16   : > { %s380_s19 = scalar_lea.sflag [#allocation3], %s203_s10  ;;  %p549_p13 = pneg %p548_p12 }
  0x17   : > { %s501_s30 = smul.u32 80, %s691_s29  ;;  %s487_s11 = sshll.u32 %s691_s29, 4 }
  0x18   : > { %s215_s20 = scalar_lea.vmem %s754_s3, %s487_s11 }
  0x19   : > { %s210_s7 = scalar_lea.vmem %s751_s0, %s501_s30  ;;  %s709_s30 = scalar_lea.hbm %s755_s4, %s488_s22 }
  0x1a   : > { %v217_v3 = vld [vmem:[%s210_s7 + $0x8] sm:$0xff]  ;;  %v474_v4 = vld [vmem:[%s210_s7 + $0x18] sm:$0xff]  ;;  %v216_v8 = vld [vmem:[%s210_s7] sm:$0xff] }
  0x1b   : > { %v476_v5 = vld [vmem:[%s210_s7 + $0x28] sm:$0xff]  ;;  %v478_v6 = vld [vmem:[%s210_s7 + $0x38] sm:$0xff]  ;;  %v473_v11 = vld [vmem:[%s210_s7 + $0x10] sm:$0xff] }
  0x1c   : > { %v480_v7 = vld [vmem:[%s210_s7 + $0x48] sm:$0xff]  ;;  %v231_v9 = vadd.f32 %v478_v6, %v474_v4  ;;  %v475_v12 = vld [vmem:[%s210_s7 + $0x20] sm:$0xff]  ;;  %v477_v13 = vld [vmem:[%s210_s7 + $0x30] sm:$0xff]  ;;  %v235_v14 = vsub.f32 %v474_v4, %v478_v6 }
  0x1d   : > { %v233_v10 = vadd.f32 %v480_v7, %v476_v5  ;;  %v239_v15 = vsub.f32 %v476_v5, %v480_v7  ;;  %v479_v16 = vld [vmem:[%s210_s7 + $0x40] sm:$0xff]  ;;  %v230_v17 = vadd.f32 %v477_v13, %v473_v11  ;;  %v234_v18 = vsub.f32 %v473_v11, %v477_v13  ;;  %s550_s7 = sshll.u32 %s612_s6, 4  ;;  %s551_s7 = int_to_ptr.vmem [resolvable:$false] %s550_s7 }
  0x1e   : > { %v489_v20 = vpack.c.bf16 %v231_v9, %v217_v3  ;;  %v232_v21 = vadd.f32 %v479_v16, %v475_v12  ;;  %v237_v22 = vand.u32 2147483647, %v235_v14  ;;  %v238_v26 = vsub.f32 %v475_v12, %v479_v16  ;;  %s552_s8 = scalar_lea.vmem %s551_s7, 512  ;;  %p553_p0 = scmp.lt.s32.totalorder %s711_s27, %s551_s7 }
  0x1f   : > { %v243_v19 = vadd.f32 %v233_v10, %v231_v9  ;;  %v491_v23 = vpack.c.bf16 %v230_v17, %v216_v8  ;;  %v236_v24 = vand.u32 2147483647, %v234_v18  ;;  %v241_v25 = vand.u32 2147483647, %v239_v15  ;;  %p554_p1 = scmp.lt.s32.totalorder %s552_s8, %s546_s5 }
  0x20   : > { %490 = vmatprep.subr.bf16.mxu0 %v489_v20  ;;  %v242_v28 = vadd.f32 %v232_v21, %v230_v17  ;;  %v493_v29 = vpack.c.bf16 %v237_v22, %v233_v10  ;;  %v240_v32 = vand.u32 2147483647, %v238_v26 }
  0x21   : > { %v245_v27 = vmul.f32 0.25, %v243_v19  ;;  %492 = vmatpush1.bf16.msra.mxu0 %v491_v23  ;;  %v495_v30 = vpack.c.bf16 %v236_v24, %v232_v21  ;;  %v497_v31 = vpack.c.bf16 %v243_v19, %v241_v25  ;;  %p555_p2 = por %p554_p1, %p553_p0 }
  0x22   : > { %v244_v35 = vmul.f32 0.25, %v242_v28  ;;  %494 = vmatprep.subr.bf16.mxu0 %v493_v29  ;;  %v499_v41 = vpack.c.bf16 %v242_v28, %v240_v32 }
  0x23   : > { %v247_v33 = vsub.f32 %v474_v4, %v245_v27  ;;  %v251_v34 = vsub.f32 %v478_v6, %v245_v27  ;;  %v249_v36 = vsub.f32 %v476_v5, %v245_v27  ;;  %v253_v37 = vsub.f32 %v480_v7, %v245_v27  ;;  %p556_p3 = pnand %p555_p2, %p549_p13 }
  0x24   : > { %v246_v39 = vsub.f32 %v473_v11, %v244_v35  ;;  %v250_v40 = vsub.f32 %v477_v13, %v244_v35  ;;  %v248_v44 = vsub.f32 %v475_v12, %v244_v35  ;;  %v252_v45 = vsub.f32 %v479_v16, %v244_v35  ;;  %v367_v11 = vld [vmem:[%s215_s20] sm:$0xff]  ;;  %v368_v12 = vld [vmem:[%s215_s20 + $0x8] sm:$0xff] }
  0x25   : > { %v255_v38 = vmul.f32 %v247_v33, %v247_v33  ;;  %v261_v42 = vmul.f32 %v251_v34, %v251_v34  ;;  %496 = vmatpush1.bf16.msra.mxu0 %v495_v30  ;;  %v257_v43 = vmul.f32 %v249_v36, %v249_v36  ;;  %v265_v48 = vmul.f32 %v253_v37, %v253_v37 }
  0x26   : > { %v254_v46 = vmul.f32 %v246_v39, %v246_v39  ;;  %498 = vmatprep.subr.bf16.mxu0 %v497_v31  ;;  %v256_v49 = vmul.f32 %v248_v44, %v248_v44  ;;  %v260_v50 = vmul.f32 %v250_v40, %v250_v40  ;;  %v264_v53 = vmul.f32 %v252_v45, %v252_v45 }
  0x27   : > { %v259_v47 = vadd.f32 %v257_v43, %v255_v38 }
  0x28   : > { %v258_v52 = vadd.f32 %v256_v49, %v254_v46 }
  0x29   : > { %500 = vmatpush1.bf16.msra.mxu0 %v499_v41  ;;  %v263_v51 = vadd.f32 %v261_v42, %v259_v47 }
  0x2a   : > { %v262_v55 = vadd.f32 %v260_v50, %v258_v52 }
  0x2b   : > { %v267_v54 = vadd.f32 %v265_v48, %v263_v51 }
  0x2c   : > { %v266_v56 = vadd.f32 %v264_v53, %v262_v55 }
  0x2d   : > { %291 = vmatprep.subr.mxu0 %v267_v54 }
  0x2e   : > { %292 = vmatpush1.msra.mxu0 %v266_v56 }
  0x2f   : > { %481 = vmatmul.mubr.msk.f32.vlgmr.msra.gmra.mrb[0].mxu0 %vm275_vm0, %v268_v57 }
  0x8e   : > { %v273_v58 = vpop.permute.xlu0 %272 }
 0x102   : > { %v345_v59 = vpop.f32.mrb[0].mxu0 }
 0x103   : > { %v346_v60 = vadd.f32 %v345_v59, %v273_v58  ;;  %v347_v61 = vpop.f32.mrb[1].mxu0 }
 0x104   : > { %v348_v62 = vadd.f32 %v347_v61, %v273_v58 }
 0x106   : > { %v350_v63 = vadd.f32 %v348_v62, %v346_v60 }
 0x108   : > { %351 = vadd.xlane.f32.xlu0 %v350_v63 }
 0x195   : > { %v352_v0 = vpop.xlane.xlu0 %351 }
 0x196   : > { %v354_v1 = vmul.f32 0.00390625, %v352_v0 }
 0x198   : > { %v355_v2 = vsub.f32 %v346_v60, %v354_v1  ;;  %v356_v3 = vsub.f32 %v348_v62, %v354_v1 }
 0x19a   : > { %v357_v4 = vmul.f32 %v355_v2, %v355_v2  ;;  %v358_v5 = vmul.f32 %v356_v3, %v356_v3 }
 0x19c   : > { %v359_v6 = vadd.f32 %v358_v5, %v357_v4 }
 0x19e   : > { %360 = vadd.xlane.f32.xlu1 %v359_v6 }
 0x22b   : > { %v361_v7 = vpop.xlane.xlu1 %360 }
 0x22c   : > { %v362_v8 = vmul.f32 0.00390625, %v361_v7 }
 0x22e   : > { %v363_v9 = vadd.f32 1e-05, %v362_v8 }
 0x230   : > { %544 = vrsqrt.f32 %v363_v9 }
 0x23a   : > { %v545_v10 = vpop.eup %544 }
 0x23b   : > { %v365_v13 = vmul.f32 %v545_v10, %v355_v2  ;;  %v366_v14 = vmul.f32 %v545_v10, %v356_v3 }
 0x23d   : > { %v369_v15 = vadd.f32 %v367_v11, %v365_v13  ;;  %v370_v16 = vadd.f32 %v368_v12, %v366_v14 }
 0x23f   : > { %vm371_vm1 = vcmp.gt.f32.partialorder %v369_v15, 0.0  ;;  %vm372_vm2 = vcmp.gt.f32.partialorder %v370_v16, 0.0  ;;  %v373_v17 = vmul.f32 0.01, %v369_v15  ;;  %v374_v18 = vmul.f32 0.01, %v370_v16 }
 0x241   : > { %v375_v19 = vsel %vm371_vm1, %v369_v15, %v373_v17  ;;  %v376_v20 = vsel %vm372_vm2, %v370_v16, %v374_v18 }
 0x242   : > { %377 = vst [vmem:[%s205_s23] sm:$0xff] %v375_v19  ;;  %378 = vst [vmem:[%s205_s23 + $0x8] sm:$0xff] %v376_v20 }
 0x243   : > { %559 = shalt.err (!%p556_p3)
}
 0x244   : > { %s560_s9 = scalar_lea.hbm %s709_s30, 256  ;;  %s564_s12 = scalar_lea.hbm %s755_s4, 512 }
 0x245   : > { %p561_p4 = scmp.ne.s32.totalorder %s709_s30, %s560_s9  ;;  %p565_p9 = scmp.lt.u32.totalorder %s709_s30, %s755_s4 }
 0x246   : > { %p566_p10 = scmp.lt.u32.totalorder %s564_s12, %s560_s9  ;;  %p568_p12 = scmp.lt.u32.totalorder %s560_s9, %s709_s30 }
 0x247   : > { %p562_p7 = pnand %p561_p4, %p676_p5 }
 0x248   : > { %p567_p11 = por %p566_p10, %p565_p9 }
 0x249   : > { %p563_p8 = pneg %p562_p7 }
 0x24a   : > { %p569_p13 = por %p568_p12, %p567_p11 }
 0x24c   : > { %p570_p0 = pnand %p569_p13, %p563_p8 }
 0x24e   : > { %573 = shalt.err (!%p570_p0)
}
 0x24f   : > { %502 = dma.vmem_to_hbm [thread:$0]  (%p676_p5), %s711_s27, 256, %s709_s30, %s380_s19  }
 0x250 PF: > { %p508_p1 = scmp.ge.s32.totalorder %s608_s18, 2  ;;  %s406_s20 = sand.u32 1, %s596_s15  }
 0x251   : > { %s407_s22 = scalar_lea.sflag [#allocation3], %s406_s20 }
 0x252   : > { %p505_p2 = pnand %p508_p1, %p680_p6 }
 0x254   : > { %591 = dma.done.wait (!%p505_p2), %s407_s22, 256  }
 0x255   : > { %593 = vsyncadd (!%p505_p2), %s407_s22, 4294967040  ;;  %p14_p3 = scmp.ge.s32.totalorder %s663_s21, 4   ;;  %s758_s15 = smov %s600_s16 }
 0x256   : > { %s759_s16 = smov %s604_s17  ;;  %s760_s17 = smov %s674_s24 }
 0x257   : > { %s761_s18 = smov %s663_s21  ;;  %16 = sbr.rel (!%p14_p3) target bundleno = 3 (0x3), region = 78 }
 0x25e   :  { %412 = vsyncpa [#allocation3], 1 }
 0x25f   :  { %414 = vsyncpa [#allocation3 + $0x1], 1 }

// kernel: down_conv_forward.2
= control target key start
LH: loop header
LB: loop body
LE: loop exit
PB: predicated region body
PF: predicated region fallthrough
CT: control target
= control target key end

     0   :  { %s461_s12 = smov 0   ;;  %s488_s0 = inlined_call_operand.vmem [shape: f32[2,5,8,256], index: 0, kind: input, shape index: {}]   ;;  %s489_s1 = inlined_call_operand.vmem [shape: f32[8,56], index: 1, kind: input, shape index: {}]   ;;  %s490_s2 = inlined_call_operand.vmem [shape: f32[8,1], index: 2, kind: input, shape index: {}]   ;;  %s491_s3 = inlined_call_operand.vmem [shape: f32[2,8,256], index: 3, kind: output, shape index: {}]  }
   0x1 LB: > { %s385_s13 = sadd.s32 4294967295, %s437_s12   ;;  %p389_p0 = scmp.ge.s32.totalorder %s437_s12, 1  ;;  %s437_s12 = sphi %s461_s12, %s13_s12  }
   0x2   : > { %p137_p1 = scmp.lt.s32.totalorder %s437_s12, 3 }
   0x4   : > { %p138_p2 = pnand %p389_p0, %p137_p1 }
   0x5   : > { %p161_p3 = scmp.lt.s32.totalorder (!%p138_p2), %s385_s13, 1  ;;  %v224_v0 = vld [vmem:[%s490_s2] sm:$0xff] (!%p138_p2)  ;;  %v439_v1 = vmov (!%p138_p2), 0.0   ;;  %v440_v2 = vmov (!%p138_p2), 0   ;;  %vm230_vm0 = vcmask (!%p138_p2), 457728  }
   0x6   : > { %141 = sbr.rel (%p138_p2) target bundleno = 568 (0x238), region = 32  ;;  %298 = vmatprep.mubr.f32.mxu0 (!%p138_p2), %v439_v1  ;;  %428 = vset.pattern.permute.xlu0 (!%p138_p2), %v440_v2  ;;  %v223_v57 = vld [vmem:[%s489_s1] sm:$0xff] (!%p138_p2) }
   0x7   : > { %227 = vperm.xlu0 (!%p138_p2), %428, %v224_v0  }
   0xd   : > { %s493_s13 = smov (!%p161_p3, %s385_s13), 1 }
   0xe   : > { %s417_s16 = smul.u32 80, %s493_s13  ;;  %s404_s22 = sshll.u32 %s493_s13, 4 }
   0xf   : > { %s170_s25 = scalar_lea.vmem %s491_s3, %s404_s22 }
  0x10   : > { %s165_s19 = scalar_lea.vmem %s488_s0, %s417_s16 }
  0x11   : > { %v172_v3 = vld [vmem:[%s165_s19 + $0x8] sm:$0xff]  ;;  %v394_v4 = vld [vmem:[%s165_s19 + $0x18] sm:$0xff]  ;;  %v171_v8 = vld [vmem:[%s165_s19] sm:$0xff] }
  0x12   : > { %v396_v5 = vld [vmem:[%s165_s19 + $0x28] sm:$0xff]  ;;  %v398_v6 = vld [vmem:[%s165_s19 + $0x38] sm:$0xff]  ;;  %v393_v11 = vld [vmem:[%s165_s19 + $0x10] sm:$0xff] }
  0x13   : > { %v400_v7 = vld [vmem:[%s165_s19 + $0x48] sm:$0xff]  ;;  %v186_v9 = vadd.f32 %v398_v6, %v394_v4  ;;  %v395_v12 = vld [vmem:[%s165_s19 + $0x20] sm:$0xff]  ;;  %v397_v13 = vld [vmem:[%s165_s19 + $0x30] sm:$0xff]  ;;  %v190_v14 = vsub.f32 %v394_v4, %v398_v6 }
  0x14   : > { %v188_v10 = vadd.f32 %v400_v7, %v396_v5  ;;  %v194_v15 = vsub.f32 %v396_v5, %v400_v7  ;;  %v399_v16 = vld [vmem:[%s165_s19 + $0x40] sm:$0xff]  ;;  %v185_v17 = vadd.f32 %v397_v13, %v393_v11  ;;  %v189_v18 = vsub.f32 %v393_v11, %v397_v13 }
  0x15   : > { %v405_v20 = vpack.c.bf16 %v186_v9, %v172_v3  ;;  %v187_v21 = vadd.f32 %v399_v16, %v395_v12  ;;  %v192_v22 = vand.u32 2147483647, %v190_v14  ;;  %v193_v26 = vsub.f32 %v395_v12, %v399_v16 }
  0x16   : > { %v198_v19 = vadd.f32 %v188_v10, %v186_v9  ;;  %v407_v23 = vpack.c.bf16 %v185_v17, %v171_v8  ;;  %v191_v24 = vand.u32 2147483647, %v189_v18  ;;  %v196_v25 = vand.u32 2147483647, %v194_v15 }
  0x17   : > { %406 = vmatprep.subr.bf16.mxu0 %v405_v20  ;;  %v197_v28 = vadd.f32 %v187_v21, %v185_v17  ;;  %v409_v29 = vpack.c.bf16 %v192_v22, %v188_v10  ;;  %v195_v32 = vand.u32 2147483647, %v193_v26 }
  0x18   : > { %v200_v27 = vmul.f32 0.25, %v198_v19  ;;  %408 = vmatpush1.bf16.msra.mxu0 %v407_v23  ;;  %v411_v30 = vpack.c.bf16 %v191_v24, %v187_v21  ;;  %v413_v31 = vpack.c.bf16 %v198_v19, %v196_v25 }
  0x19   : > { %v199_v35 = vmul.f32 0.25, %v197_v28  ;;  %410 = vmatprep.subr.bf16.mxu0 %v409_v29  ;;  %v415_v41 = vpack.c.bf16 %v197_v28, %v195_v32 }
  0x1a   : > { %v202_v33 = vsub.f32 %v394_v4, %v200_v27  ;;  %v206_v34 = vsub.f32 %v398_v6, %v200_v27  ;;  %v204_v36 = vsub.f32 %v396_v5, %v200_v27  ;;  %v208_v37 = vsub.f32 %v400_v7, %v200_v27 }
  0x1b   : > { %v201_v39 = vsub.f32 %v393_v11, %v199_v35  ;;  %v205_v40 = vsub.f32 %v397_v13, %v199_v35  ;;  %v203_v44 = vsub.f32 %v395_v12, %v199_v35  ;;  %v207_v45 = vsub.f32 %v399_v16, %v199_v35 }
  0x1c   : > { %v210_v38 = vmul.f32 %v202_v33, %v202_v33  ;;  %v216_v42 = vmul.f32 %v206_v34, %v206_v34  ;;  %412 = vmatpush1.bf16.msra.mxu0 %v411_v30  ;;  %v212_v43 = vmul.f32 %v204_v36, %v204_v36  ;;  %v220_v48 = vmul.f32 %v208_v37, %v208_v37 }
  0x1d   : > { %v209_v46 = vmul.f32 %v201_v39, %v201_v39  ;;  %414 = vmatprep.subr.bf16.mxu0 %v413_v31  ;;  %v211_v49 = vmul.f32 %v203_v44, %v203_v44  ;;  %v215_v50 = vmul.f32 %v205_v40, %v205_v40  ;;  %v219_v53 = vmul.f32 %v207_v45, %v207_v45 }
  0x1e   : > { %v214_v47 = vadd.f32 %v212_v43, %v210_v38 }
  0x1f   : > { %v213_v52 = vadd.f32 %v211_v49, %v209_v46 }
  0x20   : > { %416 = vmatpush1.bf16.msra.mxu0 %v415_v41  ;;  %v218_v51 = vadd.f32 %v216_v42, %v214_v47 }
  0x21   : > { %v217_v55 = vadd.f32 %v215_v50, %v213_v52 }
  0x22   : > { %v222_v54 = vadd.f32 %v220_v48, %v218_v51 }
  0x23   : > { %v221_v56 = vadd.f32 %v219_v53, %v217_v55 }
  0x24   : > { %246 = vmatprep.subr.mxu0 %v222_v54 }
  0x25   : > { %247 = vmatpush1.msra.mxu0 %v221_v56 }
  0x26   : > { %401 = vmatmul.mubr.msk.f32.vlgmr.msra.gmra.mrb[0].mxu0 %vm230_vm0, %v223_v57 }
  0x86   : > { %v228_v58 = vpop.permute.xlu0 %227 }
  0xf9   : > { %v300_v59 = vpop.f32.mrb[0].mxu0 }
  0xfa   : > { %v301_v60 = vadd.f32 %v300_v59, %v228_v58  ;;  %v302_v61 = vpop.f32.mrb[1].mxu0 }
  0xfb   : > { %v303_v62 = vadd.f32 %v302_v61, %v228_v58 }
  0xfd   : > { %v305_v63 = vadd.f32 %v303_v62, %v301_v60 }
  0xff   : > { %306 = vadd.xlane.f32.xlu0 %v305_v63 }
 0x18c   : > { %v307_v0 = vpop.xlane.xlu0 %306 }
 0x18d   : > { %v309_v1 = vmul.f32 0.00390625, %v307_v0 }
 0x18f   : > { %v310_v2 = vsub.f32 %v301_v60, %v309_v1  ;;  %v311_v3 = vsub.f32 %v303_v62, %v309_v1 }
 0x191   : > { %v312_v4 = vmul.f32 %v310_v2, %v310_v2  ;;  %v313_v5 = vmul.f32 %v311_v3, %v311_v3 }
 0x193   : > { %v314_v6 = vadd.f32 %v313_v5, %v312_v4 }
 0x195   : > { %315 = vadd.xlane.f32.xlu1 %v314_v6 }
 0x222   : > { %v316_v7 = vpop.xlane.xlu1 %315 }
 0x223   : > { %v317_v8 = vmul.f32 0.00390625, %v316_v7 }
 0x225   : > { %v318_v9 = vadd.f32 1e-05, %v317_v8 }
 0x227   : > { %429 = vrsqrt.f32 %v318_v9 }
 0x231   : > { %v430_v10 = vpop.eup %429 }
 0x232   : > { %v320_v11 = vmul.f32 %v430_v10, %v310_v2  ;;  %v321_v12 = vmul.f32 %v430_v10, %v311_v3 }
 0x234   : > { %vm322_vm1 = vcmp.gt.f32.partialorder %v320_v11, 0.0  ;;  %vm323_vm2 = vcmp.gt.f32.partialorder %v321_v12, 0.0  ;;  %v324_v13 = vmul.f32 0.01, %v320_v11  ;;  %v325_v14 = vmul.f32 0.01, %v321_v12 }
 0x236   : > { %v326_v15 = vsel %vm322_vm1, %v320_v11, %v324_v13  ;;  %v327_v16 = vsel %vm323_vm2, %v321_v12, %v325_v14 }
 0x237   : > { %328 = vst [vmem:[%s170_s25] sm:$0xff] %v326_v15  ;;  %329 = vst [vmem:[%s170_s25 + $0x8] sm:$0xff] %v327_v16 }
 0x238 PF: > { %s13_s12 = sadd.s32 1, %s437_s12  }
 0x239   : > { %p10_p4 = scmp.ge.s32.totalorder %s13_s12, 4  }
 0x23b   :  { %12 = sbr.rel (!%p10_p4) target bundleno = 1 (0x1), region = 66 }

</bundles_post_ra>
